<compile_context>
chip_gen: v7x
topology: tpu7x:2x2x1
jax: 0.10.0
libtpu: 0.0.40
codegen_flags: <defaults>
</compile_context>

<pallas_src>
import math
import jax
import jax.numpy as jnp
from jax.experimental import pallas as pl
from jax.experimental.pallas import tpu as pltpu


# --------------------------------------------------------------------------
# Batch-block selection
# --------------------------------------------------------------------------

def _pick_batch_block(B, C, HW, dtype_bytes=4, vmem_budget=4 << 20):
    """Largest divisor of B whose double-buffered in+out slabs fit the budget
    while keeping >= 2 grid steps (megacore) whenever B >= 2."""
    slab = C * HW * dtype_bytes
    cap = max(1, vmem_budget // (4 * slab))   # in + out, each double-buffered
    tb = 1
    for d in range(1, B + 1):
        if B % d == 0 and d <= cap and (B // d) >= min(2, B):
            tb = d
    return tb


# --------------------------------------------------------------------------
# Fused ChannelAttention kernel
# --------------------------------------------------------------------------

def channel_attention(x_nchw, params, use_pallas=True):
    """x_nchw: (B, C, H, W) f32.  Returns (B, C, H, W) f32.

    params:
      w1  : (C,   mid)   == conv1.weight[m, c, 0, 0].T
      b1  : (mid,)       == conv1.bias
      w2t : (C,   mid)   == conv2.weight[c, m, 0, 0]
      b2  : (C,)         == conv2.bias
    """
    B, C, H, W = x_nchw.shape
    HW = H * W
    w1, b1, w2t, b2 = params["w1"], params["b1"], params["w2t"], params["b2"]
    mid = w1.shape[1]

    x3 = x_nchw.reshape(B, C, HW)          # lane-dense: HW on the 128-lane axis

    if not use_pallas:                     # pure-JAX reference path
        avg = jnp.mean(x3, axis=2)                                   # (B, C)
        h = jnp.maximum(avg @ w1 + b1.reshape(1, mid), 0.0)          # (B, mid)
        s = jax.nn.sigmoid(h @ w2t.T + b2.reshape(1, C))             # (B, C)
        return (x3 * s[:, :, None]).reshape(B, C, H, W)

    TB = _pick_batch_block(B, C, HW, x3.dtype.itemsize)

    def kernel(x_ref, w1_ref, b1_ref, w2t_ref, b2_ref, o_ref):
        # Static unroll over the TB batches in this block (TB is tiny).
        for t in range(TB):
            xt = x_ref[t]                                            # (C, HW)
            # AdaptiveAvgPool2d(1): mean over the lane (spatial) axis.
            avg = jnp.mean(xt, axis=1, keepdims=True)                # (C, 1)
            # 1x1 conv #1 + ReLU: h[m] = relu(sum_c avg[c]*w1[c,m] + b1[m])
            h = jnp.sum(avg * w1_ref[...], axis=0, keepdims=True)    # (1, mid)
            h = jnp.maximum(h + b1_ref[...], 0.0)
            # 1x1 conv #2 + Sigmoid: s[c] = sigmoid(sum_m h[m]*w2t[c,m] + b2[c])
            s = jnp.sum(w2t_ref[...] * h, axis=1, keepdims=True)     # (C, 1)
            scale = jax.nn.sigmoid(s + b2_ref[...])                  # (C, 1)
            # Per-channel gate, broadcast over the lane (spatial) axis.
            o_ref[t] = (xt * scale).astype(o_ref.dtype)

    out = pl.pallas_call(
        kernel,
        out_shape=jax.ShapeDtypeStruct((B, C, HW), x_nchw.dtype),
        grid=(B // TB,),
        in_specs=[
            pl.BlockSpec((TB, C, HW), lambda b: (b, 0, 0)),
            pl.BlockSpec((C, mid), lambda b: (0, 0)),
            pl.BlockSpec((1, mid), lambda b: (0, 0)),
            pl.BlockSpec((C, mid), lambda b: (0, 0)),
            pl.BlockSpec((C, 1), lambda b: (0, 0)),
        ],
        out_specs=pl.BlockSpec((TB, C, HW), lambda b: (b, 0, 0)),
        compiler_params=pltpu.CompilerParams(
            dimension_semantics=("parallel",)),
    )(x3, w1, b1.reshape(1, mid), w2t, b2.reshape(C, 1))

    return out.reshape(B, C, H, W)


# --------------------------------------------------------------------------
# Deterministic synthetic parameters (matches nn.Conv2d default init scale)
# --------------------------------------------------------------------------

def init_params(key, in_channels, num_features, reduction=16):
    mid = max(num_features // reduction, 1)
    k1, k2, k3, k4 = jax.random.split(key, 4)
    s1 = 1.0 / math.sqrt(in_channels)      # fan_in of 1x1 conv #1
    s2 = 1.0 / math.sqrt(mid)              # fan_in of 1x1 conv #2
    return {
        # conv1.weight (mid, C, 1, 1) stored transposed as (C, mid)
        "w1": jax.random.uniform(k1, (in_channels, mid), jnp.float32, -s1, s1),
        "b1": jax.random.uniform(k2, (mid,), jnp.float32, -s1, s1),
        # conv2.weight (C, mid, 1, 1) stored as (C, mid)
        "w2t": jax.random.uniform(k3, (num_features, mid), jnp.float32, -s2, s2),
        "b2": jax.random.uniform(k4, (num_features,), jnp.float32, -s2, s2),
    }


if __name__ == "__main__":
    # in_channels == num_features (required for the x * y broadcast in torch);
    # reduction=16 -> num_features must be >= 16 for a non-empty bottleneck.
    B, C, H, W = 2, 16, 16, 16
    key = jax.random.PRNGKey(0)
    kx, kp = jax.random.split(key)

    x = jax.random.normal(kx, (B, C, H, W), jnp.float32)     # NCHW, like torch
    params = init_params(kp, C, C, reduction=16)

    out = jax.block_until_ready(channel_attention(x, params, use_pallas=True))
    ref = jax.block_until_ready(channel_attention(x, params, use_pallas=False))

    assert out.shape == (B, C, H, W)
    err = float(jnp.max(jnp.abs(out - ref)))
    assert err < 1e-4, f"Pallas output mismatch vs JAX reference: max |diff| = {err}"
    print("KERNEL_OK")
</pallas_src>

<mosaic_0001>
module attributes {stable_mosaic.version = 11 : i64} {
  func.func @kernel(%arg0: i32, %arg1: memref<1x16x256xf32, #tpu.memory_space<vmem>>, %arg2: memref<16x1xf32, #tpu.memory_space<vmem>>, %arg3: memref<1x1xf32, #tpu.memory_space<vmem>>, %arg4: memref<16x1xf32, #tpu.memory_space<vmem>>, %arg5: memref<16x1xf32, #tpu.memory_space<vmem>>, %arg6: memref<1x16x256xf32, #tpu.memory_space<vmem>>) attributes {dimension_semantics = [#tpu.dimension_semantics<parallel>], iteration_bounds = array<i64: 2>, scalar_prefetch = 0 : i64, scratch_operands = 0 : i64, tpu.core_type = #tpu.core_type<tc>, window_params = [{transform_indices = @transform_0, window_bounds = array<i64: 1, 16, 256>}, {pipeline_mode = #tpu.pipeline_mode<synchronous>, transform_indices = @transform_1, window_bounds = array<i64: 16, 1>}, {pipeline_mode = #tpu.pipeline_mode<synchronous>, transform_indices = @transform_2, window_bounds = array<i64: 1, 1>}, {pipeline_mode = #tpu.pipeline_mode<synchronous>, transform_indices = @transform_3, window_bounds = array<i64: 16, 1>}, {pipeline_mode = #tpu.pipeline_mode<synchronous>, transform_indices = @transform_4, window_bounds = array<i64: 16, 1>}, {transform_indices = @transform_5, window_bounds = array<i64: 1, 16, 256>}]} {
    %c0 = arith.constant 0 : index
    %c0_0 = arith.constant 0 : index
    %c0_1 = arith.constant 0 : index
    %0 = vector.load %arg1[%c0, %c0_0, %c0_1] : memref<1x16x256xf32, #tpu.memory_space<vmem>>, vector<1x16x256xf32>
    %1 = vector.shape_cast %0 : vector<1x16x256xf32> to vector<16x256xf32>
    %cst = arith.constant dense<0.000000e+00> : vector<16xf32>
    %2 = vector.multi_reduction <add>, %1, %cst [1] : vector<16x256xf32> to vector<16xf32>
    %3 = vector.shape_cast %2 : vector<16xf32> to vector<16x1xf32>
    %cst_2 = arith.constant 2.560000e+02 : f32
    %4 = vector.broadcast %cst_2 : f32 to vector<16x1xf32>
    %5 = arith.divf %3, %4 : vector<16x1xf32>
    %c0_3 = arith.constant 0 : index
    %c0_4 = arith.constant 0 : index
    %6 = vector.load %arg2[%c0_3, %c0_4] : memref<16x1xf32, #tpu.memory_space<vmem>>, vector<16x1xf32>
    %7 = arith.mulf %5, %6 : vector<16x1xf32>
    %cst_5 = arith.constant dense<0.000000e+00> : vector<1xf32>
    %8 = vector.multi_reduction <add>, %7, %cst_5 [0] : vector<16x1xf32> to vector<1xf32>
    %9 = vector.shape_cast %8 : vector<1xf32> to vector<1x1xf32>
    %c0_6 = arith.constant 0 : index
    %c0_7 = arith.constant 0 : index
    %10 = vector.load %arg3[%c0_6, %c0_7] : memref<1x1xf32, #tpu.memory_space<vmem>>, vector<1x1xf32>
    %11 = arith.addf %9, %10 : vector<1x1xf32>
    %cst_8 = arith.constant 0.000000e+00 : f32
    %12 = vector.broadcast %cst_8 : f32 to vector<1x1xf32>
    %13 = arith.maximumf %11, %12 : vector<1x1xf32>
    %c0_9 = arith.constant 0 : index
    %c0_10 = arith.constant 0 : index
    %14 = vector.load %arg4[%c0_9, %c0_10] : memref<16x1xf32, #tpu.memory_space<vmem>>, vector<16x1xf32>
    %15 = vector.broadcast %13 : vector<1x1xf32> to vector<16x1xf32>
    %16 = arith.mulf %14, %15 : vector<16x1xf32>
    %cst_11 = arith.constant dense<0.000000e+00> : vector<16xf32>
    %17 = vector.multi_reduction <add>, %16, %cst_11 [1] : vector<16x1xf32> to vector<16xf32>
    %18 = vector.shape_cast %17 : vector<16xf32> to vector<16x1xf32>
    %c0_12 = arith.constant 0 : index
    %c0_13 = arith.constant 0 : index
    %19 = vector.load %arg5[%c0_12, %c0_13] : memref<16x1xf32, #tpu.memory_space<vmem>>, vector<16x1xf32>
    %20 = arith.addf %18, %19 : vector<16x1xf32>
    %21 = arith.negf %20 : vector<16x1xf32>
    %22 = math.exp %21 : vector<16x1xf32>
    %cst_14 = arith.constant 1.000000e+00 : f32
    %23 = vector.broadcast %cst_14 : f32 to vector<16x1xf32>
    %24 = arith.addf %23, %22 : vector<16x1xf32>
    %25 = arith.divf %23, %24 : vector<16x1xf32>
    %26 = vector.broadcast %25 : vector<16x1xf32> to vector<16x256xf32>
    %27 = arith.mulf %1, %26 : vector<16x256xf32>
    %c0_15 = arith.constant 0 : index
    %c0_16 = arith.constant 0 : index
    %c0_17 = arith.constant 0 : index
    %28 = vector.load %arg6[%c0_15, %c0_16, %c0_17] : memref<1x16x256xf32, #tpu.memory_space<vmem>>, vector<1x16x256xf32>
    %29 = vector.shape_cast %28 : vector<1x16x256xf32> to vector<16x256xf32>
    %30 = vector.shape_cast %27 : vector<16x256xf32> to vector<1x16x256xf32>
    tpu.vector_store %arg6[%c0_15, %c0_16, %c0_17], %30 {strides = array<i32>} : memref<1x16x256xf32, #tpu.memory_space<vmem>>, vector<1x16x256xf32>,
    return
  }
  func.func @transform_0(%arg0: i32) -> (i32, i32, i32) {
    %c0_i32 = arith.constant 0 : i32
    %c0_i32_0 = arith.constant 0 : i32
    %c0_i32_1 = arith.constant 0 : i32
    return %arg0, %c0_i32, %c0_i32_0 : i32, i32, i32
  }
  func.func @transform_1(%arg0: i32) -> (i32, i32) {
    %c0_i32 = arith.constant 0 : i32
    %c0_i32_0 = arith.constant 0 : i32
    %c0_i32_1 = arith.constant 0 : i32
    return %c0_i32, %c0_i32_0 : i32, i32
  }
  func.func @transform_2(%arg0: i32) -> (i32, i32) {
    %c0_i32 = arith.constant 0 : i32
    %c0_i32_0 = arith.constant 0 : i32
    %c0_i32_1 = arith.constant 0 : i32
    return %c0_i32, %c0_i32_0 : i32, i32
  }
  func.func @transform_3(%arg0: i32) -> (i32, i32) {
    %c0_i32 = arith.constant 0 : i32
    %c0_i32_0 = arith.constant 0 : i32
    %c0_i32_1 = arith.constant 0 : i32
    return %c0_i32, %c0_i32_0 : i32, i32
  }
  func.func @transform_4(%arg0: i32) -> (i32, i32) {
    %c0_i32 = arith.constant 0 : i32
    %c0_i32_0 = arith.constant 0 : i32
    %c0_i32_1 = arith.constant 0 : i32
    return %c0_i32, %c0_i32_0 : i32, i32
  }
  func.func @transform_5(%arg0: i32) -> (i32, i32, i32) {
    %c0_i32 = arith.constant 0 : i32
    %c0_i32_0 = arith.constant 0 : i32
    %c0_i32_1 = arith.constant 0 : i32
    return %arg0, %c0_i32, %c0_i32_0 : i32, i32, i32
  }
}

</mosaic_0001>

<bundles_post_ra>
// kernel: tpu_custom_call.1
= control target key start
LH: loop header
LB: loop body
LE: loop exit
PB: predicated region body
PF: predicated region fallthrough
CT: control target
= control target key end

     0   :  { %s815_s0 = inlined_call_operand.hbm [shape: f32[2,16,256], index: 0, kind: input, shape index: {}]   ;;  %s816_s1 = inlined_call_operand.vmem [shape: f32[16,1], index: 1, kind: input, shape index: {}]   ;;  %s817_s2 = inlined_call_operand.<no memory space> [shape: f32[1,1], index: 2, kind: input, shape index: {}]   ;;  %s818_s3 = inlined_call_operand.vmem [shape: f32[16,1], index: 3, kind: input, shape index: {}]   ;;  %s819_s4 = inlined_call_operand.vmem [shape: f32[16,1], index: 4, kind: input, shape index: {}]   ;;  %s820_s5 = inlined_call_operand.hbm [shape: f32[2,16,256], index: 5, kind: output, shape index: {}]  }
   0x1   :  { %v10_v0 = vstv %s817_s2 }
   0x2   :  { %11 = vst [vmem:[#allocation2] sm:$0x1] %v10_v0 }
   0x3   :  { %12 = vsyncpa [#allocation4], 0 }
   0x4   :  { %14 = vsyncpa [#allocation4 + $0x1], 0 }
   0x5   :  { %15 = vsyncpa [#allocation5], 0 }
   0x6   :  { %17 = vsyncpa [#allocation5 + $0x1], 0  ;;  %s623_s20 = smov 0   ;;  %s625_s21 = smov 0  }
   0x7   :  { %s627_s22 = smov 0   ;;  %s629_s23 = smov 0  }
   0x8 LB: > { %s644_s2 = sadd.s32 4294967295, %s581_s23   ;;  %s406_s24 = sadd.s32 4294967294, %s581_s23   ;;  %s581_s23 = sphi %s629_s23, %s833_s23   ;;  %s577_s22 = sphi %s627_s22, %s832_s22   ;;  %s573_s21 = sphi %s625_s21, %s831_s21   ;;  %s569_s20 = sphi %s623_s20, %s830_s20  }
   0x9   : > { %s648_s25 = sadd.s32 1, %s581_s23   ;;  %s30_s26 = sadd.s32 1, %s577_s22 }
   0xa   : > { %s27_s27 = ssub.s32 %s581_s23, %s648_s25  ;;  %p37_p0 = scmp.ne.s32.totalorder %s577_s22, %s573_s21 }
   0xb   : > { %p28_p1 = scmp.eq.s32.totalorder %s27_s27, 0  ;;  %p38_p2 = scmp.eq.s32.totalorder %s581_s23, 0 }
   0xc   : > { %p43_p3 = scmp.ne.s32.totalorder %s573_s21, %s569_s20  ;;  %p44_p4 = scmp.eq.s32.totalorder %s644_s2, 0 }
   0xd   : > { %s660_s28 = scalar_select %p28_p1, %s577_s22, %s30_s26  }
   0xe   : > { %p662_p5 = por %p38_p2, %p37_p0  ;;  %p666_p6 = por %p44_p4, %p43_p3 }
   0xf   : > { %p151_p7 = scmp.eq.s32.totalorder %s644_s2, 1  ;;  %p157_p8 = scmp.eq.s32.totalorder %s406_s24, 1 }
  0x10   : > { %p436_p10 = scmp.lt.s32.totalorder %s581_s23, 2  ;;  %s189_s8 = sand.u32 1, %s577_s22  }
  0x11   : > { %p673_p11 = por %p151_p7, %p37_p0  ;;  %p677_p12 = por %p157_p8, %p43_p3 }
  0x12   : > { %s422_s9 = sshll.u32 %s581_s23, 9  ;;  %s409_s10 = sshll.u32 %s189_s8, 5 }
  0x13   : > { %s824_s6 = scalar_select %p673_p11, 1, 0 }
  0x14   : > { %s825_s7 = scalar_select %p677_p12, 1, 0 }
  0x15   : > { %s686_s13 = scalar_lea.hbm %s815_s0, %s422_s9  ;;  %s193_s14 = scalar_lea.vmem [#allocation3], %s409_s10 }
  0x16   : > { %s200_s15 = sshll.u32 %s193_s14, 4  ;;  %p690_p13 = pnand %p436_p10, %p662_p5  ;;  %s694_s15 = int_to_ptr.vmem [resolvable:$true] %s200_s15 }
  0x17   : > { %s696_s17 = scalar_lea.sflag [#allocation4], %s189_s8  ;;  %s485_s18 = scalar_lea.hbm %s686_s13, 512 }
  0x18   : > { %p486_p0 = scmp.ne.s32.totalorder %s686_s13, %s485_s18  ;;  %p487_p1 = pneg %p690_p13 }
  0x19   : > { %s490_s26 = scalar_lea.hbm %s815_s0, 1024  ;;  %p491_p4 = scmp.lt.u32.totalorder %s686_s13, %s815_s0 }
  0x1a   : > { %p488_p2 = pnand %p487_p1, %p486_p0  ;;  %p492_p5 = scmp.lt.u32.totalorder %s490_s26, %s485_s18 }
  0x1b   : > { %p494_p8 = scmp.lt.u32.totalorder %s485_s18, %s686_s13 }
  0x1c   : > { %p489_p3 = pneg %p488_p2  ;;  %p493_p7 = por %p492_p5, %p491_p4 }
  0x1e   : > { %p495_p10 = por %p494_p8, %p493_p7 }
  0x20   : > { %p496_p9 = pnand %p495_p10, %p489_p3 }
  0x22   : > { %499 = shalt.err (!%p496_p9)
}
  0x23   : > { %s500_s8 = scalar_lea.vmem %s694_s15, 512  ;;  %s583_s9 = smov [#allocation3]  }
  0x24   : > { %p501_p0 = scmp.ne.s32.totalorder %s694_s15, %s500_s8  ;;  %s505_s10 = sshll.u32 %s583_s9, 4  ;;  %s506_s10 = int_to_ptr.vmem [resolvable:$false] %s505_s10 }
  0x25   : > { %s507_s11 = scalar_lea.vmem %s506_s10, 1024  ;;  %p508_p11 = scmp.lt.s32.totalorder %s694_s15, %s506_s10 }
  0x26   : > { %p503_p2 = pnand %p501_p0, %p487_p1  ;;  %p509_p4 = scmp.lt.s32.totalorder %s507_s11, %s500_s8 }
  0x28   : > { %p504_p12 = pneg %p503_p2  ;;  %p510_p5 = por %p509_p4, %p508_p11 }
  0x2a   : > { %p511_p7 = pnand %p510_p5, %p504_p12 }
  0x2c   : > { %514 = shalt.err (!%p511_p7)
}
  0x2d   : > { %s584_s12 = smov 256   ;;  %s585_s14 = smov 16  }
  0x2e   : > { %431 = dma.hbm_to_vmem [thread:$0]  (!%p690_p13), %s686_s13, 512, %s694_s15, %s696_s17, %s584_s12, %s584_s12, %s585_s14  }
  0x2f   : > { %p412_p9 = scmp.ge.s32.totalorder %s581_s23, 1  ;;  %p208_p1 = scmp.lt.s32.totalorder %s581_s23, 3 }
  0x31   : > { %p209_p3 = pnand %p412_p9, %p208_p1 }
  0x32   : > { %s727_s18 = sand.u32 (!%p209_p3), 1, %s573_s21  }
  0x33   : > { %212 = sbr.rel (%p209_p3) target bundleno = 413 (0x19d), region = 40  ;;  %s413_s19 = sshll.u32 (!%p209_p3), %s727_s18, 5 }
  0x34   : > { %s215_s24 = scalar_lea.sflag (!%p209_p3), [#allocation4], %s727_s18  ;;  %s218_s26 = scalar_lea.vmem (!%p209_p3), [#allocation3], %s413_s19 }
  0x3a   : > { %560 = dma.done.wait (%p666_p6), %s215_s24, 512  }
  0x3b   : > { %562 = vsyncadd (%p666_p6), %s215_s24, 4294966784  ;;  %v245_v1 = vld [vmem:[%s218_s26] sm:$0xff]  ;;  %v246_v2 = vld [vmem:[%s218_s26 + $0x8] sm:$0xff]  ;;  %v586_v7 = vmov 0   ;;  %vm262_vm0 = vcmask 7168   ;;  %v277_v21 = vlaneseq  ;;  %s244_s14 = scalar_lea.vmem [#allocation6], %s413_s19 }
  0x3c   : > { %v737_v3 = vld [vmem:[%s218_s26 + $0x10] sm:$0xff]  ;;  %v249_v4 = vadd.f32 %v246_v2, %v245_v1  ;;  %v739_v5 = vld [vmem:[%s218_s26 + $0x18] sm:$0xff]  ;;  %475 = vset.pattern.permute.xlu1 %v586_v7  ;;  %476 = vset.pattern.permute.xlu0 %v586_v7  ;;  %v259_v11 = vld [vmem:[%s816_s1 + $0x8] sm:$0xff]  ;;  %s333_s24 = sshll.u32 %s244_s14, 4  ;;  %s423_s26 = sshll.u32 %s644_s2, 9  ;;  %s764_s24 = int_to_ptr.vmem [resolvable:$true] %s333_s24 }
  0x3d   : > { %v252_v6 = vadd.f32 %v739_v5, %v737_v3  ;;  %v258_v10 = vld [vmem:[%s816_s1] sm:$0xff]  ;;  %v278_v24 = vshrl.u32 %v277_v21, 7  ;;  %v276_v31 = vld [vmem:[%s818_s3 + $0x8] sm:$0xff]  ;;  %s769_s15 = scalar_lea.hbm %s820_s5, %s423_s26  ;;  %s320_s2 = scalar_lea.sflag [#allocation5], %s727_s18 }
  0x3e   : > { %250 = vadd.xlane.f32.xlu0 %v249_v4  ;;  %v272_v26 = vld [vmem:[#allocation2] sm:$0x1]  ;;  %v286_v34 = vld [vmem:[%s819_s4 + $0x8] sm:$0xff]  ;;  %s515_s19 = scalar_lea.vmem %s764_s24, 512  ;;  %p827_p11 = scmp.ne.s32.totalorder %s824_s6, 0 }
  0x3f   : > { %v279_v28 = vsub.s32 0, %v278_v24  ;;  %v275_v32 = vld [vmem:[%s818_s3] sm:$0xff]  ;;  %p516_p6 = scmp.ne.s32.totalorder %s764_s24, %s515_s19  ;;  %s587_s16 = smov [#allocation6]  }
  0x40   : > { %v285_v35 = vld [vmem:[%s819_s4] sm:$0xff]  ;;  %s519_s17 = sshll.u32 %s587_s16, 4  ;;  %s520_s17 = int_to_ptr.vmem [resolvable:$false] %s519_s17 }
  0x41   : > { %p517_p12 = pnand %p516_p6, %p827_p11  ;;  %s521_s27 = scalar_lea.vmem %s520_s17, 1024 }
  0x42   : > { %253 = vadd.xlane.f32.xlu0 %v252_v6  ;;  %p522_p8 = scmp.lt.s32.totalorder %s764_s24, %s520_s17  ;;  %p523_p10 = scmp.lt.s32.totalorder %s521_s27, %s515_s19 }
  0x43   : > { %p518_p13 = pneg %p517_p12 }
  0x44   : > { %p524_p0 = por %p523_p10, %p522_p8 }
  0x46   : > { %p525_p2 = pnand %p524_p0, %p518_p13 }
  0xcb   : > { %v251_v8 = vpop.xlane.xlu0 %250 }
  0xcc   : > { %v256_v9 = vmul.f32 0.00390625, %v251_v8 }
  0xce   : > { %v260_v13 = vmul.f32 %v258_v10, %v256_v9 }
  0xcf   : > { %v254_v12 = vpop.xlane.xlu0 %253 }
  0xd0   : > { %v257_v14 = vmul.f32 0.00390625, %v254_v12  ;;  %v263_v16 = vsel %vm262_vm0, %v260_v13, 0.0 }
  0xd2   : > { %v261_v15 = vmul.f32 %v259_v11, %v257_v14 }
  0xd4   : > { %v264_v17 = vsel %vm262_vm0, %v261_v15, 0.0 }
  0xd5   : > { %v265_v18 = vadd.f32 %v264_v17, %v263_v16 }
  0xd7   : > { %v266_v19 = vrot.slane %v265_v18, 4 }
  0xd9   : > { %v267_v20 = vadd.f32 %v266_v19, %v265_v18 }
  0xdb   : > { %v268_v22 = vrot.slane %v267_v20, 2 }
  0xdd   : > { %v269_v23 = vadd.f32 %v268_v22, %v267_v20 }
  0xdf   : > { %v270_v25 = vrot.slane %v269_v23, 1 }
  0xe1   : > { %v271_v27 = vadd.f32 %v270_v25, %v269_v23 }
  0xe3   : > { %v273_v29 = vadd.f32 %v272_v26, %v271_v27 }
  0xe5   : > { %v274_v30 = vmax.f32 %v273_v29, 0.0 }
  0xe7   : > { %v280_v33 = vrot.slane %v274_v30, %v279_v28 }
  0xe9   : > { %v282_v36 = vmul.f32 %v280_v33, %v276_v31  ;;  %v281_v37 = vmul.f32 %v280_v33, %v275_v32 }
  0xeb   : > { %v288_v38 = vadd.f32 %v286_v34, %v282_v36  ;;  %v287_v39 = vadd.f32 %v285_v35, %v281_v37 }
  0xed   : > { %v416_v40 = vmul.f32 -1.442695, %v288_v38  ;;  %v415_v41 = vmul.f32 -1.442695, %v287_v39 }
  0xef   : > { %477 = vpow2.f32 %v416_v40 }
  0xf0   : > { %479 = vpow2.f32 %v415_v41 }
  0xf9   : > { %v478_v42 = vpop.eup %477 }
  0xfa   : > { %v480_v43 = vpop.eup %479  ;;  %v296_v45 = vadd.f32 1.0, %v478_v42 }
  0xfb   : > { %v295_v44 = vadd.f32 1.0, %v480_v43 }
  0xfd   : > { %481 = vrcp.f32 %v295_v44 }
  0xfe   : > { %483 = vrcp.f32 %v296_v45 }
 0x107   : > { %v482_v46 = vpop.eup %481 }
 0x108   : > { %303 = vperm.xlu1 %475, %v482_v46   ;;  %v484_v47 = vpop.eup %483 }
 0x10c   : > { %308 = vperm.xlu1 %475, %v484_v47  }
 0x187   : > { %v304_v48 = vpop.permute.xlu1 %303 }
 0x188   : > { %v311_v49 = vmul.f32 %v304_v48, %v245_v1  ;;  %v312_v50 = vmul.f32 %v304_v48, %v246_v2 }
 0x18a   : > { %315 = vst [vmem:[%s244_s14] sm:$0xff] %v311_v49  ;;  %316 = vst [vmem:[%s244_s14 + $0x8] sm:$0xff] %v312_v50 }
 0x18b   : > { %v309_v51 = vpop.permute.xlu1 %308 }
 0x18c   : > { %v313_v52 = vmul.f32 %v309_v51, %v737_v3  ;;  %v314_v53 = vmul.f32 %v309_v51, %v739_v5 }
 0x18e   : > { %317 = vst [vmem:[%s244_s14 + $0x10] sm:$0xff] %v313_v52  ;;  %318 = vst [vmem:[%s244_s14 + $0x18] sm:$0xff] %v314_v53 }
 0x18f   : > { %528 = shalt.err (!%p525_p2)
}
 0x190   : > { %s529_s29 = scalar_lea.hbm %s769_s15, 512  ;;  %s533_s10 = scalar_lea.hbm %s820_s5, 1024 }
 0x191   : > { %p530_p4 = scmp.ne.s32.totalorder %s769_s15, %s529_s29  ;;  %p534_p9 = scmp.lt.u32.totalorder %s769_s15, %s820_s5 }
 0x192   : > { %p535_p1 = scmp.lt.u32.totalorder %s533_s10, %s529_s29  ;;  %p537_p6 = scmp.lt.u32.totalorder %s529_s29, %s769_s15 }
 0x193   : > { %p531_p5 = pnand %p530_p4, %p827_p11 }
 0x194   : > { %p536_p3 = por %p535_p1, %p534_p9 }
 0x195   : > { %p532_p7 = pneg %p531_p5 }
 0x196   : > { %p538_p12 = por %p537_p6, %p536_p3 }
 0x198   : > { %p539_p13 = pnand %p538_p12, %p532_p7 }
 0x19a   : > { %542 = shalt.err (!%p539_p13)
}
 0x19b   : > { %s588_s14 = smov 256   ;;  %s589_s26 = smov 16  }
 0x19c   : > { %426 = dma.vmem_to_hbm [thread:$0]  (%p827_p11), %s764_s24, 512, %s769_s15, %s320_s2, %s588_s14, %s588_s14, %s589_s26  }
 0x19d PF: > { %s348_s13 = sand.u32 1, %s569_s20   ;;  %p828_p8 = scmp.ne.s32.totalorder %s825_s7, 0 }
 0x19e   : > { %p829_p10 = scmp.ge.s32.totalorder %s581_s23, 2  ;;  %s349_s30 = scalar_lea.sflag [#allocation5], %s348_s13 }
 0x1a0   : > { %p433_p0 = pnand %p829_p10, %p828_p8 }
 0x1a2   : > { %564 = dma.done.wait (!%p433_p0), %s349_s30, 512  }
 0x1a3   : > { %566 = vsyncadd (!%p433_p0), %s349_s30, 4294966784  ;;  %p20_p2 = scmp.ge.s32.totalorder %s648_s25, 4   ;;  %s830_s20 = smov %s573_s21 }
 0x1a4   : > { %s831_s21 = smov %s577_s22  ;;  %s832_s22 = smov %s660_s28 }
 0x1a5   : > { %s833_s23 = smov %s648_s25  ;;  %22 = sbr.rel (!%p20_p2) target bundleno = 8 (0x8), region = 85 }
 0x1ac   :  { %354 = vsyncpa [#allocation4], 1 }
 0x1ad   :  { %356 = vsyncpa [#allocation4 + $0x1], 1 }
 0x1ae   :  { %357 = vsyncpa [#allocation5], 1 }
 0x1af   :  { %359 = vsyncpa [#allocation5 + $0x1], 1 }

</bundles_post_ra>
